<compile_context>
chip_gen: v5e
topology: v5e:2x2
jax: 0.10.0
libtpu: 0.0.40
codegen_flags: <defaults>
</compile_context>

<pallas_src>
import functools
import math

import jax
import jax.numpy as jnp
from jax.experimental import pallas as pl
from jax.experimental.pallas import tpu as pltpu


# ---------------- chip-aware defaults ----------------

def _tpu_tiling_defaults():
    """Per-generation tile sizes / scoped-VMEM budget.  Conservative when unknown."""
    kind = ""
    try:
        kind = jax.devices()[0].device_kind.lower()
    except Exception:
        pass
    if "v7" in kind:
        # 64 MiB physical VMEM per TensorCore: 256-wide MXU tiles, explicit budget so
        # double-buffering survives.  (Parallel grid extents should be >=2 so both
        # TensorCores get work; B*H and M//tm normally satisfy that.)
        return dict(lin=(512, 512, 512), attn=(256, 256), vmem=48 * 1024 * 1024)
    if "v6" in kind:
        # 2x256^2 MXU, 128 MiB VMEM: bigger tiles, fewer grid steps, less re-streaming.
        return dict(lin=(512, 512, 1024), attn=(256, 256), vmem=64 * 1024 * 1024)
    if "v5" in kind:
        # v5e: 4x128^2 MXU; keep 128-wide attention tiles, raise the 16 MiB scoped default.
        return dict(lin=(256, 256, 512), attn=(128, 128), vmem=32 * 1024 * 1024)
    return dict(lin=(256, 256, 512), attn=(128, 128), vmem=None)


def _compiler_params(dim_semantics, vmem_limit):
    kw = dict(dimension_semantics=dim_semantics)
    if vmem_limit:
        kw["vmem_limit_bytes"] = int(vmem_limit)
    return pltpu.CompilerParams(**kw)


def _pick_tile(dim, target, align=1):
    """Largest divisor of `dim` that is <= target, preferring multiples of `align`.

    TODO(synk): for pathological dims (e.g. primes) padding + masking would beat the
    tiny-divisor fallback; not needed for the shapes exercised here.
    """
    if dim <= target:
        return dim
    best = None
    for t in range(target, 0, -1):
        if dim % t == 0:
            if t % align == 0:
                return t
            if best is None:
                best = t
    return best if best is not None else dim


# ---------------- tiled linear:  y = x @ W + b ----------------

def _linear_kernel(x_ref, w_ref, b_ref, o_ref, acc_ref):
    k = pl.program_id(2)

    @pl.when(k == 0)
    def _():
        acc_ref[...] = jnp.zeros_like(acc_ref)

    # bf16 MXU operands, f32 accumulation.
    acc_ref[...] += jnp.dot(x_ref[...].astype(jnp.bfloat16),
                            w_ref[...].astype(jnp.bfloat16),
                            preferred_element_type=jnp.float32)

    @pl.when(k == pl.num_programs(2) - 1)
    def _():
        o_ref[...] = (acc_ref[...] + b_ref[...].astype(jnp.float32)).astype(o_ref.dtype)


def pallas_linear(x2d, w, b, *, tm=256, tn=256, tk=512, out_dtype=None, vmem_limit=None):
    M, K = x2d.shape
    K2, N = w.shape
    assert K == K2
    out_dtype = x2d.dtype if out_dtype is None else out_dtype
    tm = _pick_tile(M, tm, align=8)
    tn = _pick_tile(N, tn, align=128)
    tk = _pick_tile(K, tk, align=128)
    grid = (M // tm, N // tn, K // tk)
    # Note: for c_attn (N = 3*C) tn can be raised toward N on v6e (128 MiB VMEM) to cut
    # the N/tn-fold re-streaming of x when the linear is memory-bound.
    return pl.pallas_call(
        _linear_kernel,
        out_shape=jax.ShapeDtypeStruct((M, N), out_dtype),
        grid=grid,
        in_specs=[
            pl.BlockSpec((tm, tk), lambda i, j, k: (i, k)),
            pl.BlockSpec((tk, tn), lambda i, j, k: (k, j)),
            pl.BlockSpec((1, tn), lambda i, j, k: (0, j)),
        ],
        out_specs=pl.BlockSpec((tm, tn), lambda i, j, k: (i, j)),
        scratch_shapes=[pltpu.VMEM((tm, tn), jnp.float32)],
        compiler_params=_compiler_params(("parallel", "parallel", "arbitrary"), vmem_limit),
    )(x2d, w, b.reshape(1, N))


# ---------------- flash-style causal attention, heads on the grid ----------------

def _attn_kernel(q_ref, k_ref, v_ref, o_ref, m_sc, l_sc, acc_sc, *, tq, tk, causal):
    qi = pl.program_id(2)
    ki = pl.program_id(3)
    nk = pl.num_programs(3)

    @pl.when(ki == 0)
    def _init():
        m_sc[...] = jnp.full_like(m_sc, -1e30)
        l_sc[...] = jnp.zeros_like(l_sc)
        acc_sc[...] = jnp.zeros_like(acc_sc)

    def _step():
        q = q_ref[...]                                    # (tq, D) bf16, pre-scaled
        k = k_ref[...]                                    # (tk, D) bf16
        s = jax.lax.dot_general(q, k, (((1,), (1,)), ((), ())),
                                preferred_element_type=jnp.float32)   # (tq, tk) f32
        if causal:
            row = qi * tq + jax.lax.broadcasted_iota(jnp.int32, (tq, tk), 0)
            col = ki * tk + jax.lax.broadcasted_iota(jnp.int32, (tq, tk), 1)
            s = jnp.where(col <= row, s, jnp.float32(-1e30))

        m_prev = m_sc[...]                                # (tq, 1)
        m_new = jnp.maximum(m_prev, jnp.max(s, axis=-1, keepdims=True))
        alpha = jnp.exp(m_prev - m_new)                   # (tq, 1)
        p = jnp.exp(s - m_new)                            # (tq, tk) f32
        l_sc[...] = alpha * l_sc[...] + jnp.sum(p, axis=-1, keepdims=True)
        m_sc[...] = m_new
        acc_sc[...] = alpha * acc_sc[...] + jnp.dot(
            p.astype(jnp.bfloat16), v_ref[...], preferred_element_type=jnp.float32)

    if causal:
        # Skip kv tiles strictly above the causal diagonal (DMA already skipped via
        # the clamped kv index_map in pallas_attention).
        pl.when(ki * tk <= qi * tq + (tq - 1))(_step)
    else:
        _step()

    @pl.when(ki == nk - 1)
    def _finalize():
        inv = pl.reciprocal(l_sc[...], approx=True)       # EUP slot, ~free
        o_ref[...] = (acc_sc[...] * inv).astype(o_ref.dtype)


def pallas_attention(q, k, v, n_head, *, causal=True, tq=128, tk=128, vmem_limit=None):
    B, T, C = q.shape
    assert C % n_head == 0
    D = C // n_head
    scale = 1.0 / math.sqrt(D)
    tq = _pick_tile(T, tq, align=8)
    tk = _pick_tile(T, tk, align=8)

    def to_bhtd(t):
        return t.reshape(B, T, n_head, D).transpose(0, 2, 1, 3)

    # (B,T,C) -> (B,H,T,D); the 1/sqrt(D) scale and bf16 cast fuse into this relayout
    # copy, so the kernel never re-applies the scale per kv step.
    qh = (to_bhtd(q) * scale).astype(jnp.bfloat16)
    kh = to_bhtd(k).astype(jnp.bfloat16)
    vh = to_bhtd(v).astype(jnp.bfloat16)

    grid = (B, n_head, T // tq, T // tk)

    def q_map(b, h, qi, ki):
        return (b, h, qi, 0)

    def kv_map(b, h, qi, ki):
        if causal:
            # Clamp dead (above-diagonal) kv tiles to the last live tile: the block
            # index is unchanged, so the pipeline issues no new K/V DMA for them.
            ki = jnp.minimum(ki, ((qi + 1) * tq - 1) // tk)
        return (b, h, ki, 0)

    kernel = functools.partial(_attn_kernel, tq=tq, tk=tk, causal=causal)
    out = pl.pallas_call(
        kernel,
        out_shape=jax.ShapeDtypeStruct((B, n_head, T, D), jnp.bfloat16),
        grid=grid,
        in_specs=[
            pl.BlockSpec((None, None, tq, D), q_map),
            pl.BlockSpec((None, None, tk, D), kv_map),
            pl.BlockSpec((None, None, tk, D), kv_map),
        ],
        out_specs=pl.BlockSpec((None, None, tq, D), q_map),
        scratch_shapes=[
            pltpu.VMEM((tq, 1), jnp.float32),   # running row-max m
            pltpu.VMEM((tq, 1), jnp.float32),   # running denominator l
            pltpu.VMEM((tq, D), jnp.float32),   # output accumulator
        ],
        compiler_params=_compiler_params(
            ("parallel", "parallel", "parallel", "arbitrary"), vmem_limit),
    )(qh, kh, vh)

    # back to (B, T, C); kept bf16 (the c_proj matmul consumes bf16 operands anyway).
    return out.transpose(0, 2, 1, 3).reshape(B, T, C)


# ---------------- forward pass ----------------

def self_attention_forward(x, params, n_head, *, is_causal=True):
    """Pallas implementation of SelfAttention.forward (attn_dropout=0)."""
    B, T, C = x.shape
    cfg = _tpu_tiling_defaults()
    tm, tn, tkk = cfg["lin"]
    tq, tkv = cfg["attn"]
    vmem = cfg["vmem"]

    # qkv projection (tiled Pallas matmul, bf16 MXU operands, bf16 activations out)
    qkv = pallas_linear(x.reshape(B * T, C), params["w_attn"], params["b_attn"],
                        tm=tm, tn=tn, tk=tkk, out_dtype=jnp.bfloat16, vmem_limit=vmem)
    q, k, v = jnp.split(qkv.reshape(B, T, 3 * C), 3, axis=-1)   # each (B, T, C) bf16

    # flash-style causal attention, heads on the grid
    y = pallas_attention(q, k, v, n_head, causal=is_causal,
                         tq=tq, tk=tkv, vmem_limit=vmem)

    # output projection
    y = pallas_linear(y.reshape(B * T, C), params["w_proj"], params["b_proj"],
                      tm=tm, tn=tn, tk=tkk, out_dtype=jnp.float32, vmem_limit=vmem)
    return y.reshape(B, T, C)


# ---------------- pure-JAX (f32) reference for verification ----------------

def self_attention_reference(x, params, n_head):
    B, T, C = x.shape
    D = C // n_head
    qkv = x @ params["w_attn"] + params["b_attn"]
    q, k, v = jnp.split(qkv, 3, axis=2)
    q = q.reshape(B, T, n_head, D).transpose(0, 2, 1, 3)
    k = k.reshape(B, T, n_head, D).transpose(0, 2, 1, 3)
    v = v.reshape(B, T, n_head, D).transpose(0, 2, 1, 3)
    s = jnp.einsum("bhqd,bhkd->bhqk", q, k) / math.sqrt(D)
    mask = jnp.tril(jnp.ones((T, T), dtype=bool))
    s = jnp.where(mask, s, -jnp.inf)
    p = jax.nn.softmax(s, axis=-1)
    y = jnp.einsum("bhqk,bhkd->bhqd", p, v)
    y = y.transpose(0, 2, 1, 3).reshape(B, T, C)
    return y @ params["w_proj"] + params["b_proj"]


# ---------------- main ----------------

if __name__ == "__main__":
    B, T, C, H = 2, 8, 32, 4   # n_embd=32, n_head=4, head_dim=8

    key = jax.random.PRNGKey(0)
    kx, k1, k2, k3, k4 = jax.random.split(key, 5)

    bound = 1.0 / math.sqrt(C)
    params = {
        "w_attn": jax.random.uniform(k1, (C, 3 * C), jnp.float32, -bound, bound),
        "b_attn": jax.random.uniform(k2, (3 * C,), jnp.float32, -bound, bound),
        "w_proj": jax.random.uniform(k3, (C, C), jnp.float32, -bound, bound),
        "b_proj": jax.random.uniform(k4, (C,), jnp.float32, -bound, bound),
    }

    x = jax.random.normal(kx, (B, T, C), jnp.float32)

    y = self_attention_forward(x, params, H)
    y = jax.block_until_ready(y)

    y_ref = self_attention_reference(x, params, H)
    assert y.shape == (B, T, C)
    # bf16 MXU operands => relaxed tolerance vs. the f32 reference.
    max_err = float(jnp.max(jnp.abs(y - y_ref)))
    assert jnp.allclose(y, y_ref, atol=2e-2, rtol=2e-2), f"mismatch vs reference (max abs err {max_err})"

    print("KERNEL_OK")
</pallas_src>

<mosaic_0001>
module attributes {stable_mosaic.version = 11 : i64} {
  func.func @_linear_kernel(%arg0: i32, %arg1: i32, %arg2: i32, %arg3: memref<16x32xf32, #tpu.memory_space<vmem>>, %arg4: memref<32x96xf32, #tpu.memory_space<vmem>>, %arg5: memref<1x96xf32, #tpu.memory_space<vmem>>, %arg6: memref<16x96xbf16, #tpu.memory_space<vmem>>, %arg7: memref<16x96xf32, #tpu.memory_space<vmem>>) attributes {dimension_semantics = [#tpu.dimension_semantics<parallel>, #tpu.dimension_semantics<parallel>, #tpu.dimension_semantics<arbitrary>], iteration_bounds = array<i64: 1, 1, 1>, scalar_prefetch = 0 : i64, scratch_operands = 1 : i64, tpu.core_type = #tpu.core_type<tc>, window_params = [{transform_indices = @transform_0, window_bounds = array<i64: 16, 32>}, {transform_indices = @transform_1, window_bounds = array<i64: 32, 96>}, {transform_indices = @transform_2, window_bounds = array<i64: 1, 96>}, {transform_indices = @transform_3, window_bounds = array<i64: 16, 96>}]} {
    %c0_i32 = arith.constant 0 : i32
    %0 = arith.cmpi eq, %arg2, %c0_i32 : i32
    %1 = arith.extui %0 : i1 to i32
    %c0_i32_0 = arith.constant 0 : i32
    %2 = arith.cmpi ne, %1, %c0_i32_0 : i32
    scf.if %2 {
      %cst_10 = arith.constant 0.000000e+00 : f32
      %14 = vector.broadcast %cst_10 : f32 to vector<16x96xf32>
      %c0_11 = arith.constant 0 : index
      %c0_12 = arith.constant 0 : index
      %15 = vector.load %arg7[%c0_11, %c0_12] : memref<16x96xf32, #tpu.memory_space<vmem>>, vector<16x96xf32>
      tpu.vector_store %arg7[%c0_11, %c0_12], %14 {strides = array<i32>} : memref<16x96xf32, #tpu.memory_space<vmem>>, vector<16x96xf32>,
    } else {
    }
    %c0 = arith.constant 0 : index
    %c0_1 = arith.constant 0 : index
    %3 = vector.load %arg7[%c0, %c0_1] : memref<16x96xf32, #tpu.memory_space<vmem>>, vector<16x96xf32>
    %c0_2 = arith.constant 0 : index
    %c0_3 = arith.constant 0 : index
    %4 = vector.load %arg3[%c0_2, %c0_3] : memref<16x32xf32, #tpu.memory_space<vmem>>, vector<16x32xf32>
    %5 = arith.truncf %4 : vector<16x32xf32> to vector<16x32xbf16>
    %c0_4 = arith.constant 0 : index
    %c0_5 = arith.constant 0 : index
    %6 = vector.load %arg4[%c0_4, %c0_5] : memref<32x96xf32, #tpu.memory_space<vmem>>, vector<32x96xf32>
    %7 = arith.truncf %6 : vector<32x96xf32> to vector<32x96xbf16>
    %cst = arith.constant dense<0.000000e+00> : vector<16x96xf32>
    %8 = tpu.matmul %5, %7, %cst {dimension_numbers = #tpu.dot_dimension_numbers<[1], [0], [0], [1], [0, 0, 1, 1], [], []>} : vector<16x32xbf16>, vector<32x96xbf16>, vector<16x96xf32> -> vector<16x96xf32>
    %9 = arith.addf %3, %8 : vector<16x96xf32>
    %c0_6 = arith.constant 0 : index
    %c0_7 = arith.constant 0 : index
    %10 = vector.load %arg7[%c0_6, %c0_7] : memref<16x96xf32, #tpu.memory_space<vmem>>, vector<16x96xf32>
    tpu.vector_store %arg7[%c0_6, %c0_7], %9 {strides = array<i32>} : memref<16x96xf32, #tpu.memory_space<vmem>>, vector<16x96xf32>,
    %c0_i32_8 = arith.constant 0 : i32
    %11 = arith.cmpi eq, %arg2, %c0_i32_8 : i32
    %12 = arith.extui %11 : i1 to i32
    %c0_i32_9 = arith.constant 0 : i32
    %13 = arith.cmpi ne, %12, %c0_i32_9 : i32
    scf.if %13 {
      %c0_10 = arith.constant 0 : index
      %c0_11 = arith.constant 0 : index
      %14 = vector.load %arg7[%c0_10, %c0_11] : memref<16x96xf32, #tpu.memory_space<vmem>>, vector<16x96xf32>
      %c0_12 = arith.constant 0 : index
      %c0_13 = arith.constant 0 : index
      %15 = vector.load %arg5[%c0_12, %c0_13] : memref<1x96xf32, #tpu.memory_space<vmem>>, vector<1x96xf32>
      %16 = vector.broadcast %15 : vector<1x96xf32> to vector<16x96xf32>
      %17 = arith.addf %14, %16 : vector<16x96xf32>
      %18 = arith.truncf %17 : vector<16x96xf32> to vector<16x96xbf16>
      %c0_14 = arith.constant 0 : index
      %c0_15 = arith.constant 0 : index
      %19 = vector.load %arg6[%c0_14, %c0_15] : memref<16x96xbf16, #tpu.memory_space<vmem>>, vector<16x96xbf16>
      tpu.vector_store %arg6[%c0_14, %c0_15], %18 {strides = array<i32>} : memref<16x96xbf16, #tpu.memory_space<vmem>>, vector<16x96xbf16>,
    } else {
    }
    return
  }
  func.func @transform_0(%arg0: i32, %arg1: i32, %arg2: i32) -> (i32, i32) {
    %c0_i32 = arith.constant 0 : i32
    return %arg0, %arg2 : i32, i32
  }
  func.func @transform_1(%arg0: i32, %arg1: i32, %arg2: i32) -> (i32, i32) {
    %c0_i32 = arith.constant 0 : i32
    return %arg2, %arg1 : i32, i32
  }
  func.func @transform_2(%arg0: i32, %arg1: i32, %arg2: i32) -> (i32, i32) {
    %c0_i32 = arith.constant 0 : i32
    %c0_i32_0 = arith.constant 0 : i32
    return %c0_i32, %arg1 : i32, i32
  }
  func.func @transform_3(%arg0: i32, %arg1: i32, %arg2: i32) -> (i32, i32) {
    %c0_i32 = arith.constant 0 : i32
    return %arg0, %arg1 : i32, i32
  }
}

</mosaic_0001>

<bundles_post_ra>
// kernel: tpu_custom_call.1
= control target key start
LH: loop header
LB: loop body
LE: loop exit
PB: predicated region body
PF: predicated region fallthrough
CT: control target
= control target key end

     0   :  { %8 = vsyncpa [#allocation4], 0  ;;  %s257_s0 = inlined_call_operand.hbm [shape: f32[16,32], index: 0, kind: input, shape index: {}]   ;;  %s258_s1 = inlined_call_operand.hbm [shape: f32[32,96], index: 1, kind: input, shape index: {}]   ;;  %s259_s2 = inlined_call_operand.vmem [shape: f32[1,96], index: 2, kind: input, shape index: {}]   ;;  %s260_s3 = inlined_call_operand.hbm [shape: bf16[16,96], index: 3, kind: output, shape index: {}]  }
   0x1   :  { %9 = vsyncpa [#allocation7], 0 }
   0x2   :  { %10 = vsyncpa [#allocation5], 0  ;;  %s15_s14 = sshll.u32 %s257_s0, 4  ;;  %s213_s15 = smov [#allocation3]   ;;  %s16_s14 = int_to_ptr.hbm [resolvable:$true] %s15_s14 }
   0x3   :  { %s17_s16 = sshll.u32 %s213_s15, 4  ;;  %s28_s19 = sshll.u32 %s258_s1, 4  ;;  %s18_s16 = int_to_ptr.vmem [resolvable:$true] %s17_s16  ;;  %s29_s19 = int_to_ptr.hbm [resolvable:$true] %s28_s19 }
   0x4   :  { %s214_s20 = smov 128   ;;  %s215_s21 = smov 8  }
   0x5   :  { %23 = dma.hbm_to_vmem [thread:$0]  %s16_s14, 256, %s18_s16, [#allocation4], %s214_s20, %s214_s20, %s215_s21  }
   0x6   :  { %s216_s22 = smov [#allocation6]  }
   0x7   :  { %s30_s23 = sshll.u32 %s216_s22, 4  ;;  %s31_s23 = int_to_ptr.vmem [resolvable:$true] %s30_s23 }
   0x8   :  { %36 = dma.hbm_to_vmem [thread:$0]  %s29_s19, 512, %s31_s23, [#allocation7], %s214_s20, %s214_s20, %s215_s21  }
   0x9   :  { %207 = dma.done.wait [#allocation4], 256  }
   0xa   :  { %208 = vsyncadd [#allocation4], 4294967040 }
   0xb   :  { %209 = dma.done.wait [#allocation7], 512  }
   0xc   :  { %210 = vsyncadd [#allocation7], 4294966784  ;;  %vm52_vm0 = vcmask 785408   ;;  %v217_v0 = vmov 0.0   ;;  %v62_v1 = vld [vmem:[#allocation6 + $0x10] sm:$0xff]  ;;  %v63_v2 = vld [vmem:[#allocation6 + $0x18] sm:$0xff] }
   0xd   :  { %53 = vst.msk [vmem:[#allocation2] sm:$0xff] %vm52_vm0, %v217_v0  ;;  %v60_v3 = vld [vmem:[#allocation6] sm:$0xff]  ;;  %v65_v4 = vpack.c.bf16 %v63_v2, %v62_v1  ;;  %v61_v5 = vld [vmem:[#allocation6 + $0x8] sm:$0xff]  ;;  %v57_v7 = vld [vmem:[#allocation3] sm:$0xff]  ;;  %vm66_vm1 = vcmask 261120   ;;  %vm102_vm2 = vcmask 781312  }
   0xe   :  { %54 = vst.msk [vmem:[#allocation2 + $0x8] sm:$0xff] %vm52_vm0, %v217_v0  ;;  %v64_v6 = vpack.c.bf16 %v61_v5, %v60_v3  ;;  %v58_v8 = vld [vmem:[#allocation3 + $0x8] sm:$0xff]  ;;  %v134_v14 = vld [vmem:[%s259_s2] ss:$0 sm:$0xff]  ;;  %s218_s24 = smov [#allocation8]   ;;  %s111_s28 = sshll.u32 %s260_s3, 4  ;;  %s112_s28 = int_to_ptr.hbm [resolvable:$true] %s111_s28 }
   0xf   :  { %76 = vmatpush.bf16.msra.mxu0 %v65_v4  ;;  %v59_v9 = vpack.c.bf16 %v58_v8, %v57_v7  ;;  %s109_s25 = sshll.u32 %s218_s24, 4  ;;  %s219_s2 = smov 64   ;;  %s110_s25 = int_to_ptr.vmem [resolvable:$true] %s109_s25 }
  0x10   :  { %s220_s29 = smov 4  }
  0x13   :  { %77 = vmatpush.bf16.msra.mxu0 %v64_v6 }
  0x14   :  { %v55_v10 = vld [vmem:[#allocation2] sm:$0xff] }
  0x15   :  { %v56_v13 = vld [vmem:[#allocation2 + $0x8] sm:$0xff] }
  0x16   :  { %125 = vmatmul.msk.bf16.vlgmr.msra.gmra.mxu0 %vm66_vm1, %v59_v9 }
  0x93   :  { %v79_v11 = vpop.f32.mrf.mxu0 }
  0x94   :  { %v84_v12 = vadd.f32 %v79_v11, %v55_v10 }
  0x96   :  { %87 = vst.msk [vmem:[#allocation2] sm:$0xff] %vm52_vm0, %v84_v12 }
  0x9b   :  { %v81_v15 = vpop.f32.mrf.mxu0 }
  0x9c   :  { %v85_v16 = vadd.f32 %v81_v15, %v56_v13 }
  0x9d   :  { %v92_v17 = vld [vmem:[#allocation2] sm:$0xff] }
  0x9e   :  { %88 = vst.msk [vmem:[#allocation2 + $0x8] sm:$0xff] %vm52_vm0, %v85_v16  ;;  %v98_v18 = vadd.f32 %v134_v14, %v92_v17 }
  0xa0   :  { %v100_v19 = vpack.c.bf16 %v98_v18, %v98_v18 }
  0xa2   :  { %103 = vst.msk [vmem:[#allocation8] sm:$0xf] %vm102_vm2, %v100_v19 }
  0xa5   :  { %v93_v20 = vld [vmem:[#allocation2 + $0x8] sm:$0xff] }
  0xa6   :  { %v99_v21 = vadd.f32 %v134_v14, %v93_v20 }
  0xa8   :  { %v101_v22 = vpack.c.bf16 %v99_v21, %v99_v21 }
  0xaa   :  { %104 = vst.msk [vmem:[#allocation8 + $0x4] sm:$0xf] %vm102_vm2, %v101_v22 }
  0xab   :  { %117 = dma.vmem_to_hbm [thread:$0]  %s110_s25, 128, %s112_s28, [#allocation5], %s219_s2, %s219_s2, %s220_s29  }
  0xac   :  { %211 = dma.done.wait [#allocation5], 128  }
  0xad   :  { %212 = vsyncadd [#allocation5], 4294967168 }
  0xae   :  { %122 = vsyncpa [#allocation4], 1 }
  0xaf   :  { %123 = vsyncpa [#allocation7], 1 }
  0xb0   :  { %124 = vsyncpa [#allocation5], 1 }

</bundles_post_ra>
